<compile_context>
chip_gen: v5e
topology: v5e:2x2
jax: 0.10.0
libtpu: 0.0.40
codegen_flags: <defaults>
</compile_context>

<pallas_src>
import jax
import jax.numpy as jnp
from jax.experimental import pallas as pl
from jax.experimental.pallas import tpu as pltpu


def _round_up(n, m):
    return ((n + m - 1) // m) * m


# Per-buffer budget for the double-buffered x tile (the dominant HBM stream).
_X_BUFFER_BYTES = 4 << 20          # 4 MiB per buffer -> 8 MiB double-buffered
_TK_CAP_DEFAULT = 8192             # split D beyond this so row tiles stay large
_SMALL_BATCH_FALLBACK = 128        # below this, plain XLA beats kernel launch cost


def _linear_kernel(x_ref, w_ref, b_ref, o_ref, acc_ref):
    """One (TM, TK) x-tile x (TK, 2) w-tile step with f32 accumulation over K."""
    k = pl.program_id(1)

    @pl.when(k == 0)
    def _init():
        acc_ref[...] = jnp.zeros_like(acc_ref)

    acc_ref[...] += jnp.dot(x_ref[...], w_ref[...],
                            preferred_element_type=jnp.float32)  # MXU, no transpose

    # Unconditional cheap (TM, 2) store; output block index is constant along K so
    # only the final value is written back to HBM.
    o_ref[...] = (acc_ref[...] + b_ref[...]).astype(o_ref.dtype)


def _choose_tiles(B, D, tk_cap):
    """Pick (tm, b_pad, tk, d_pad) from a VMEM budget with minimal batch padding."""
    # --- K (feature) tiling: only split very large D; keep tk lane-aligned. ---
    if D <= tk_cap:
        tk, d_pad = D, D
    else:
        tk = _round_up(tk_cap, 128)
        d_pad = _round_up(D, tk)

    # --- M (batch) tiling: budget-driven, near-divisor to minimize padding. ---
    b_pad8 = _round_up(max(B, 1), 8)
    rows_units = b_pad8 // 8                                   # 8-row chunks
    tm_units_max = max(1, _X_BUFFER_BYTES // (tk * 4 * 8))     # f32 rows per buffer

    if rows_units >= 32:       # B >= 256: give both v7x TCs >= 2 steps each
        min_steps = 4
    elif rows_units >= 2:      # enough rows for 2 tiles -> megacore can split
        min_steps = 2
    else:
        min_steps = 1

    n_steps = max(pl.cdiv(rows_units, tm_units_max), min_steps)
    n_steps = min(n_steps, rows_units)
    tm_units = pl.cdiv(rows_units, n_steps)
    n_steps = pl.cdiv(rows_units, tm_units)                    # drop empty tiles
    tm = tm_units * 8
    b_pad = n_steps * tm                                       # pad <= (n_steps-1)*8
    return tm, b_pad, tk, d_pad


def _vmem_limit_bytes(tm, tk):
    """Scoped-VMEM request sized to the tiles (with headroom), safe on v5e..v7x."""
    lane = 128
    x_b = 2 * tm * tk * 4            # double-buffered x tiles
    w_b = 2 * tk * lane * 4          # (tk, 2) weight lane-pads to 128 lanes
    o_b = 2 * tm * lane * 4          # (tm, 2) output, lane-padded
    acc_b = tm * lane * 4            # accumulator scratch
    bias_b = 2 * 8 * lane * 4
    total = x_b + w_b + o_b + acc_b + bias_b
    limit = max(int(total * 1.5) + (4 << 20), 16 << 20)
    return min(limit, 56 << 20)      # stay under v7x's 64 MiB physical VMEM


def logistic_regression_forward(x, weight, bias, *, tk_cap=None, force_pallas=False):
    """x: (B, D) f32, weight: (2, D) f32 (PyTorch layout), bias: (2,) f32 -> (B, 2)."""
    B, D = x.shape
    out_dim = weight.shape[0]
    tk_cap = _TK_CAP_DEFAULT if tk_cap is None else tk_cap

    # One-time layout work outside the kernel (weight is a constant).
    x = x.astype(jnp.float32)
    w_t = weight.T.astype(jnp.float32)            # (D, out_dim)
    bias2d = bias.reshape(1, out_dim).astype(jnp.float32)

    # Tiny batch: fixed pallas_call / DMA launch overhead dominates -> let XLA fuse.
    if not force_pallas and B <= _SMALL_BATCH_FALLBACK:
        return x @ w_t + bias2d

    tm, b_pad, tk, d_pad = _choose_tiles(B, D, tk_cap)

    x_p = x
    if b_pad != B or d_pad != D:
        x_p = jnp.pad(x, ((0, b_pad - B), (0, d_pad - D)))
    w_p = w_t if d_pad == D else jnp.pad(w_t, ((0, d_pad - D), (0, 0)))

    grid = (b_pad // tm, d_pad // tk)

    out = pl.pallas_call(
        _linear_kernel,
        out_shape=jax.ShapeDtypeStruct((b_pad, out_dim), jnp.float32),
        grid_spec=pltpu.PrefetchScalarGridSpec(
            num_scalar_prefetch=0,
            grid=grid,
            in_specs=[
                # x: stream (tm, tk) tiles (double-buffered by Pallas).
                pl.BlockSpec((tm, tk), lambda i, k: (i, k)),
                # weight: varies only along K; resident when D fits one tile.
                pl.BlockSpec((tk, out_dim), lambda i, k: (k, 0)),
                # bias: constant block -> stays resident in VMEM.
                pl.BlockSpec((1, out_dim), lambda i, k: (0, 0)),
            ],
            out_specs=pl.BlockSpec((tm, out_dim), lambda i, k: (i, 0)),
            scratch_shapes=[pltpu.VMEM((tm, out_dim), jnp.float32)],
        ),
        compiler_params=pltpu.CompilerParams(
            # Batch rows independent -> megacore-shardable on v7x; K is a reduction.
            dimension_semantics=("parallel", "arbitrary"),
            vmem_limit_bytes=_vmem_limit_bytes(tm, tk),
        ),
        cost_estimate=pl.CostEstimate(
            flops=2 * B * D * out_dim,
            bytes_accessed=4 * (B * D + D * out_dim + B * out_dim),
            transcendentals=0,
        ),
    )(x_p, w_p, bias2d)

    return out[:B] if b_pad != B else out


def reference_forward(x, weight, bias):
    return x @ weight.T + bias


if __name__ == "__main__":
    key = jax.random.PRNGKey(0)
    kx, kw, kb, kx2, kx3 = jax.random.split(key, 5)

    # Case 1: small shapes consistent with the module (batch=2, input_dim=32).
    B, D = 2, 32
    x = jax.random.normal(kx, (B, D), dtype=jnp.float32)
    bound = 1.0 / jnp.sqrt(jnp.float32(D))
    weight = jax.random.uniform(kw, (2, D), minval=-bound, maxval=bound,
                                dtype=jnp.float32)
    bias = jax.random.uniform(kb, (2,), minval=-bound, maxval=bound,
                              dtype=jnp.float32)

    ref = reference_forward(x, weight, bias)
    # Force the Pallas path so the kernel itself is exercised at tiny shapes...
    out = jax.block_until_ready(
        logistic_regression_forward(x, weight, bias, force_pallas=True))
    assert out.shape == (B, 2)
    assert jnp.allclose(out, ref, atol=1e-5, rtol=1e-5)
    # ...and also validate the default tiny-batch XLA fallback.
    out_fb = jax.block_until_ready(logistic_regression_forward(x, weight, bias))
    assert jnp.allclose(out_fb, ref, atol=1e-5, rtol=1e-5)

    # Case 2: larger batch exercises the tiled streaming path (grid of 4 row tiles,
    # only 16 padded rows instead of 1536 for B=1040).
    B2, D2 = 1040, 128
    x2 = jax.random.normal(kx2, (B2, D2), dtype=jnp.float32)
    bound2 = 1.0 / jnp.sqrt(jnp.float32(D2))
    w2 = jax.random.uniform(kw, (2, D2), minval=-bound2, maxval=bound2,
                            dtype=jnp.float32)
    b2 = jax.random.uniform(kb, (2,), minval=-bound2, maxval=bound2,
                            dtype=jnp.float32)
    out2 = jax.block_until_ready(logistic_regression_forward(x2, w2, b2))
    ref2 = reference_forward(x2, w2, b2)
    assert out2.shape == (B2, 2)
    assert jnp.allclose(out2, ref2, atol=1e-4, rtol=1e-4)

    # Case 3: exercise the D-reduction (accumulator) path with a small tk cap.
    B3, D3 = 128, 384
    x3 = jax.random.normal(kx3, (B3, D3), dtype=jnp.float32)
    bound3 = 1.0 / jnp.sqrt(jnp.float32(D3))
    w3 = jax.random.uniform(kw, (2, D3), minval=-bound3, maxval=bound3,
                            dtype=jnp.float32)
    b3 = jax.random.uniform(kb, (2,), minval=-bound3, maxval=bound3,
                            dtype=jnp.float32)
    out3 = jax.block_until_ready(
        logistic_regression_forward(x3, w3, b3, tk_cap=128, force_pallas=True))
    ref3 = reference_forward(x3, w3, b3)
    assert out3.shape == (B3, 2)
    assert jnp.allclose(out3, ref3, atol=1e-4, rtol=1e-4)

    print("KERNEL_OK")
</pallas_src>

<mosaic_0001>
module attributes {stable_mosaic.version = 11 : i64} {
  func.func @_linear_kernel(%arg0: i32, %arg1: i32, %arg2: memref<8x32xf32, #tpu.memory_space<vmem>>, %arg3: memref<32x2xf32, #tpu.memory_space<vmem>>, %arg4: memref<1x2xf32, #tpu.memory_space<vmem>>, %arg5: memref<8x2xf32, #tpu.memory_space<vmem>>, %arg6: memref<8x2xf32, #tpu.memory_space<vmem>>) attributes {dimension_semantics = [#tpu.dimension_semantics<parallel>, #tpu.dimension_semantics<arbitrary>], iteration_bounds = array<i64: 1, 1>, scalar_prefetch = 0 : i64, scratch_operands = 1 : i64, tpu.core_type = #tpu.core_type<tc>, window_params = [{transform_indices = @transform_0, window_bounds = array<i64: 8, 32>}, {transform_indices = @transform_1, window_bounds = array<i64: 32, 2>}, {pipeline_mode = #tpu.pipeline_mode<synchronous>, transform_indices = @transform_2, window_bounds = array<i64: 1, 2>}, {transform_indices = @transform_3, window_bounds = array<i64: 8, 2>}]} {
    %c0_i32 = arith.constant 0 : i32
    %0 = arith.cmpi eq, %arg1, %c0_i32 : i32
    %1 = arith.extui %0 : i1 to i32
    %c0_i32_0 = arith.constant 0 : i32
    %2 = arith.cmpi ne, %1, %c0_i32_0 : i32
    scf.if %2 {
      %cst_14 = arith.constant 0.000000e+00 : f32
      %14 = vector.broadcast %cst_14 : f32 to vector<8x2xf32>
      %c0_15 = arith.constant 0 : index
      %c0_16 = arith.constant 0 : index
      %15 = vector.load %arg6[%c0_15, %c0_16] : memref<8x2xf32, #tpu.memory_space<vmem>>, vector<8x2xf32>
      tpu.vector_store %arg6[%c0_15, %c0_16], %14 {strides = array<i32>} : memref<8x2xf32, #tpu.memory_space<vmem>>, vector<8x2xf32>,
    } else {
    }
    %c0 = arith.constant 0 : index
    %c0_1 = arith.constant 0 : index
    %3 = vector.load %arg6[%c0, %c0_1] : memref<8x2xf32, #tpu.memory_space<vmem>>, vector<8x2xf32>
    %c0_2 = arith.constant 0 : index
    %c0_3 = arith.constant 0 : index
    %4 = vector.load %arg2[%c0_2, %c0_3] : memref<8x32xf32, #tpu.memory_space<vmem>>, vector<8x32xf32>
    %c0_4 = arith.constant 0 : index
    %c0_5 = arith.constant 0 : index
    %5 = vector.load %arg3[%c0_4, %c0_5] : memref<32x2xf32, #tpu.memory_space<vmem>>, vector<32x2xf32>
    %cst = arith.constant dense<0.000000e+00> : vector<8x2xf32>
    %6 = tpu.matmul %4, %5, %cst {dimension_numbers = #tpu.dot_dimension_numbers<[1], [0], [0], [1], [0, 0, 1, 1], [], []>} : vector<8x32xf32>, vector<32x2xf32>, vector<8x2xf32> -> vector<8x2xf32>
    %7 = arith.addf %3, %6 : vector<8x2xf32>
    %c0_6 = arith.constant 0 : index
    %c0_7 = arith.constant 0 : index
    %8 = vector.load %arg6[%c0_6, %c0_7] : memref<8x2xf32, #tpu.memory_space<vmem>>, vector<8x2xf32>
    tpu.vector_store %arg6[%c0_6, %c0_7], %7 {strides = array<i32>} : memref<8x2xf32, #tpu.memory_space<vmem>>, vector<8x2xf32>,
    %c0_8 = arith.constant 0 : index
    %c0_9 = arith.constant 0 : index
    %9 = vector.load %arg6[%c0_8, %c0_9] : memref<8x2xf32, #tpu.memory_space<vmem>>, vector<8x2xf32>
    %c0_10 = arith.constant 0 : index
    %c0_11 = arith.constant 0 : index
    %10 = vector.load %arg4[%c0_10, %c0_11] : memref<1x2xf32, #tpu.memory_space<vmem>>, vector<1x2xf32>
    %11 = vector.broadcast %10 : vector<1x2xf32> to vector<8x2xf32>
    %12 = arith.addf %9, %11 : vector<8x2xf32>
    %c0_12 = arith.constant 0 : index
    %c0_13 = arith.constant 0 : index
    %13 = vector.load %arg5[%c0_12, %c0_13] : memref<8x2xf32, #tpu.memory_space<vmem>>, vector<8x2xf32>
    tpu.vector_store %arg5[%c0_12, %c0_13], %12 {strides = array<i32>} : memref<8x2xf32, #tpu.memory_space<vmem>>, vector<8x2xf32>,
    return
  }
  func.func @transform_0(%arg0: i32, %arg1: i32) -> (i32, i32) {
    %c0_i32 = arith.constant 0 : i32
    return %arg0, %arg1 : i32, i32
  }
  func.func @transform_1(%arg0: i32, %arg1: i32) -> (i32, i32) {
    %c0_i32 = arith.constant 0 : i32
    %c0_i32_0 = arith.constant 0 : i32
    return %arg1, %c0_i32 : i32, i32
  }
  func.func @transform_2(%arg0: i32, %arg1: i32) -> (i32, i32) {
    %c0_i32 = arith.constant 0 : i32
    %c0_i32_0 = arith.constant 0 : i32
    %c0_i32_1 = arith.constant 0 : i32
    return %c0_i32, %c0_i32_0 : i32, i32
  }
  func.func @transform_3(%arg0: i32, %arg1: i32) -> (i32, i32) {
    %c0_i32 = arith.constant 0 : i32
    %c0_i32_0 = arith.constant 0 : i32
    return %arg0, %c0_i32 : i32, i32
  }
}

</mosaic_0001>

<bundles_post_ra>
// kernel: tpu_custom_call.1
= control target key start
LH: loop header
LB: loop body
LE: loop exit
PB: predicated region body
PF: predicated region fallthrough
CT: control target
= control target key end

     0   :  { %vm18_vm0 = vcmask 15360   ;;  %v67_v2 = vmov 0.0   ;;  %vm26_vm1 = vcmask 261120   ;;  %s112_s1 = inlined_call_operand.vmem [shape: f32[32,2], index: 1, kind: input, shape index: {}]   ;;  %s113_s2 = inlined_call_operand.vmem [shape: f32[1,2], index: 2, kind: input, shape index: {}]   ;;  %s114_s0 = inlined_call_operand.vmem [shape: f32[8,32], index: 0, kind: input, shape index: {}]   ;;  %s115_s3 = inlined_call_operand.vmem [shape: f32[8,2], index: 3, kind: output, shape index: {}]  }
   0x1   :  { %v25_v0 = vld [vmem:[%s112_s1 + $0x18] sm:$0xff]  ;;  %v24_v1 = vld [vmem:[%s112_s1 + $0x10] sm:$0xff]  ;;  %19 = vst.msk [vmem:[#allocation2] sm:$0xff] %vm18_vm0, %v67_v2  ;;  %v23_v3 = vld [vmem:[%s112_s1 + $0x8] sm:$0xff] }
   0x2   :  { %42 = vmatpush.msra.mxu0 %v25_v0  ;;  %v22_v4 = vld [vmem:[%s112_s1] sm:$0xff] }
   0x3   :  { %v21_v5 = vld [vmem:[%s114_s0] sm:$0xff] }
   0x4   :  { %43 = vmatpush.msra.mxu0 %v24_v1  ;;  %v66_v9 = vld [vmem:[%s113_s2] ss:$0 sm:$0xff] }
   0x6   :  { %44 = vmatpush.msra.mxu0 %v23_v3 }
   0x8   :  { %45 = vmatpush.msra.mxu0 %v22_v4  ;;  %v20_v6 = vld [vmem:[#allocation2] sm:$0xff] }
   0x9   :  { %64 = vmatmul.msk.f32.vlgmr.msra.gmra.mxu0 %vm26_vm1, %v21_v5 }
  0x86   :  { %v47_v7 = vpop.f32.mrf.mxu0 }
  0x87   :  { %v50_v8 = vadd.f32 %v47_v7, %v20_v6 }
  0x89   :  { %52 = vst.msk [vmem:[#allocation2] sm:$0xff] %vm18_vm0, %v50_v8 }
  0x90   :  { %v53_v10 = vld [vmem:[#allocation2] sm:$0xff] }
  0x91   :  { %v58_v11 = vadd.f32 %v66_v9, %v53_v10 }
  0x93   :  { %59 = vst.msk [vmem:[%s115_s3] sm:$0xff] %vm18_vm0, %v58_v11 }

</bundles_post_ra>
